<compile_context>
chip_gen: v7x
topology: tpu7x:2x2x1
jax: 0.10.0
libtpu: 0.0.40
codegen_flags: <defaults>
</compile_context>

<pallas_src>
import jax
import jax.numpy as jnp
from jax.experimental import pallas as pl
from jax.experimental.pallas import tpu as pltpu


def _round_up(v, m):
    return ((v + m - 1) // m) * m


def tsm_head_kernel(x_ref, w_ref, b_ref, feat_ref, cls_ref):
    # x_ref:    (Bn, T, C, HW)  activations for Bn samples (all their segments)
    # w_ref:    (C, Kp)         fc_cls weight (transposed, zero-padded to Kp lanes)
    # b_ref:    (1, Kp)         fc_cls bias   (zero-padded to Kp lanes)
    # feat_ref: (Bn, 1, C)      per-sample feat (mean over segments & space)
    # cls_ref:  (Bn, 1, Kp)     per-sample cls_score (consensus already applied)
    _, T, C, HW = x_ref.shape

    x = x_ref[...]                                        # (Bn, T, C, HW), f32

    # Segment sum first (plain VPU adds across T), then a single cross-lane
    # (XLU) reduce over HW per (Bn, C) row; 1/(T*HW) folded into one scale.
    seg_sum = jnp.sum(x, axis=1)                          # (Bn, C, HW)
    feat = jnp.sum(seg_sum, axis=-1) * (1.0 / (T * HW))   # (Bn, C)

    # TODO(synk): nn.Dropout is identity at inference; training-mode dropout
    # (per-segment RNG masks) is intentionally not modeled — it is also what
    # makes the consensus-before-linear fusion below exact.

    feat_ref[:, 0, :] = feat.astype(feat_ref.dtype)

    # cls = AvgConsensus(Linear(pooled)) == Linear(feat): one batched MXU matmul.
    cls = jnp.dot(feat, w_ref[...], preferred_element_type=jnp.float32) + b_ref[...]
    cls_ref[:, 0, :] = cls.astype(cls_ref.dtype)


def tsm_head_forward(x_nchw, w_t, b, num_segments):
    """x_nchw: (M, C, D, D) f32 ; w_t: (C, K) ; b: (K,) -> (feat (N, C), cls (N, K))."""
    M, C, D, _ = x_nchw.shape
    K = w_t.shape[1]
    # mmaction layout: the num_segments frames of a sample are contiguous along M.
    assert M % num_segments == 0
    N = M // num_segments
    T = num_segments
    HW = D * D

    # Free, contiguous reshape — no NCHW transpose / HBM round-trip.
    x = x_nchw.reshape(N, T, C, HW)

    # Pad K up to a 128-lane multiple so the cls output store is lane-dense.
    # (Tiny weight tensors; under jit these pads fold into constants.)
    Kp = _round_up(K, 128)
    w_p = jnp.pad(w_t, ((0, 0), (0, Kp - K)))
    b_p = jnp.pad(b.reshape(1, K), ((0, 0), (0, Kp - K)))

    # ---- choose samples-per-step Bn against the *padded* VMEM footprint ----
    itemsize = x.dtype.itemsize
    per_sample_vmem = T * _round_up(C, 8) * _round_up(HW, 128) * itemsize
    x_budget = 20 * 1024 * 1024                 # double-buffered x block, v7x-safe
    bn_cap = max(1, x_budget // (2 * per_sample_vmem))
    Bn = int(min(N, 128, bn_cap))
    if N > 1:
        # keep >= 2 grid steps so both v7x TensorCores get work (megacore split)
        Bn = min(Bn, -(-N // 2))
    Bn = max(Bn, 1)

    num_blocks = -(-N // Bn)
    Np = num_blocks * Bn
    if Np != N:
        x = jnp.pad(x, ((0, Np - N), (0, 0), (0, 0), (0, 0)))

    # TODO(synk): if the backbone emits bf16, feed x in bf16 (halves HBM reads)
    # and upcast in-register; kept f32 here to match the module's dtype exactly.

    flops = 2 * N * C * Kp + N * T * C * HW
    bytes_accessed = (itemsize * x.size + 4 * (w_p.size + b_p.size)
                      + 4 * (Np * C + Np * Kp))

    feat3, cls3 = pl.pallas_call(
        tsm_head_kernel,
        grid=(num_blocks,),
        in_specs=[
            pl.BlockSpec((Bn, T, C, HW), lambda n: (n, 0, 0, 0)),
            pl.BlockSpec((C, Kp), lambda n: (0, 0)),
            pl.BlockSpec((1, Kp), lambda n: (0, 0)),
        ],
        out_specs=[
            pl.BlockSpec((Bn, 1, C), lambda n: (n, 0, 0)),
            pl.BlockSpec((Bn, 1, Kp), lambda n: (n, 0, 0)),
        ],
        out_shape=[
            jax.ShapeDtypeStruct((Np, 1, C), jnp.float32),
            jax.ShapeDtypeStruct((Np, 1, Kp), jnp.float32),
        ],
        compiler_params=pltpu.CompilerParams(
            dimension_semantics=("parallel",),
            vmem_limit_bytes=48 * 1024 * 1024,
        ),
        cost_estimate=pl.CostEstimate(
            flops=flops, transcendentals=0, bytes_accessed=bytes_accessed
        ),
    )(x, w_p, b_p)

    feat = feat3[:N, 0, :]
    cls = cls3[:N, 0, :K]          # strip lane padding (and any N padding)
    return feat, cls


def reference_forward(x_nchw, w_t, b, num_segments):
    M, C, D, _ = x_nchw.shape
    N = M // num_segments
    pooled = jnp.mean(x_nchw, axis=(2, 3))                       # (M, C)
    feat = pooled.reshape(N, num_segments, C).mean(axis=1)       # (N, C)
    cls = pooled @ w_t + b[None, :]                              # (M, K)
    cls = cls.reshape(N, num_segments, -1).mean(axis=1)          # (N, K)
    return feat, cls


if __name__ == "__main__":
    # Small shapes consistent with the module:
    #   num_classes=16, in_channels=32, num_segments=8, input_size=128 -> D=4
    num_classes = 16
    in_channels = 32
    num_segments = 8
    input_size = 128
    downsample = input_size // 32          # = 4
    batch = 2
    M = batch * num_segments               # 16

    key = jax.random.PRNGKey(0)
    kx, kw, kb = jax.random.split(key, 3)

    x = jax.random.normal(kx, (M, in_channels, downsample, downsample), jnp.float32)
    # fc_cls: deterministic synthetic init; bias zeros like normal_init.
    w = jax.random.normal(kw, (num_classes, in_channels), jnp.float32) * 0.02
    b = jnp.zeros((num_classes,), jnp.float32)
    w_t = w.T                               # (C, K) for x @ W^T

    feat, cls = tsm_head_forward(x, w_t, b, num_segments)
    feat = jax.block_until_ready(feat)
    cls = jax.block_until_ready(cls)

    feat_ref, cls_ref = reference_forward(x, w_t, b, num_segments)
    assert jnp.allclose(feat, feat_ref, atol=1e-5, rtol=1e-5)
    assert jnp.allclose(cls, cls_ref, atol=1e-5, rtol=1e-5)

    print("KERNEL_OK")
</pallas_src>

<mosaic_0001>
module attributes {stable_mosaic.version = 11 : i64} {
  func.func @tsm_head_kernel(%arg0: i32, %arg1: memref<1x8x32x16xf32, #tpu.memory_space<vmem>>, %arg2: memref<32x128xf32, #tpu.memory_space<vmem>>, %arg3: memref<1x128xf32, #tpu.memory_space<vmem>>, %arg4: memref<1x1x32xf32, #tpu.memory_space<vmem>>, %arg5: memref<1x1x128xf32, #tpu.memory_space<vmem>>) attributes {dimension_semantics = [#tpu.dimension_semantics<parallel>], iteration_bounds = array<i64: 2>, scalar_prefetch = 0 : i64, scratch_operands = 0 : i64, tpu.core_type = #tpu.core_type<tc>, window_params = [{transform_indices = @transform_0, window_bounds = array<i64: 1, 8, 32, 16>}, {pipeline_mode = #tpu.pipeline_mode<synchronous>, transform_indices = @transform_1, window_bounds = array<i64: 32, 128>}, {pipeline_mode = #tpu.pipeline_mode<synchronous>, transform_indices = @transform_2, window_bounds = array<i64: 1, 128>}, {transform_indices = @transform_3, window_bounds = array<i64: 1, 1, 32>}, {transform_indices = @transform_4, window_bounds = array<i64: 1, 1, 128>}]} {
    %c0 = arith.constant 0 : index
    %c0_0 = arith.constant 0 : index
    %c0_1 = arith.constant 0 : index
    %c0_2 = arith.constant 0 : index
    %0 = vector.load %arg1[%c0, %c0_0, %c0_1, %c0_2] : memref<1x8x32x16xf32, #tpu.memory_space<vmem>>, vector<1x8x32x16xf32>
    %cst = arith.constant dense<0.000000e+00> : vector<1x32x16xf32>
    %1 = vector.multi_reduction <add>, %0, %cst [1] : vector<1x8x32x16xf32> to vector<1x32x16xf32>
    %cst_3 = arith.constant dense<0.000000e+00> : vector<1x32xf32>
    %2 = vector.multi_reduction <add>, %1, %cst_3 [2] : vector<1x32x16xf32> to vector<1x32xf32>
    %cst_4 = arith.constant 7.812500e-03 : f32
    %3 = vector.broadcast %cst_4 : f32 to vector<1x32xf32>
    %4 = arith.mulf %2, %3 : vector<1x32xf32>
    %c0_5 = arith.constant 0 : index
    %c0_6 = arith.constant 0 : index
    %c0_7 = arith.constant 0 : index
    %5 = vector.load %arg4[%c0_5, %c0_6, %c0_7] : memref<1x1x32xf32, #tpu.memory_space<vmem>>, vector<1x1x32xf32>
    %6 = vector.shape_cast %5 : vector<1x1x32xf32> to vector<1x32xf32>
    %7 = vector.shape_cast %4 : vector<1x32xf32> to vector<1x1x32xf32>
    tpu.vector_store %arg4[%c0_5, %c0_6, %c0_7], %7 {strides = array<i32>} : memref<1x1x32xf32, #tpu.memory_space<vmem>>, vector<1x1x32xf32>,
    %c0_8 = arith.constant 0 : index
    %c0_9 = arith.constant 0 : index
    %8 = vector.load %arg2[%c0_8, %c0_9] : memref<32x128xf32, #tpu.memory_space<vmem>>, vector<32x128xf32>
    %cst_10 = arith.constant dense<0.000000e+00> : vector<1x128xf32>
    %9 = tpu.matmul %4, %8, %cst_10 {dimension_numbers = #tpu.dot_dimension_numbers<[1], [0], [0], [1], [0, 0, 1, 1], [], []>} : vector<1x32xf32>, vector<32x128xf32>, vector<1x128xf32> -> vector<1x128xf32>
    %c0_11 = arith.constant 0 : index
    %c0_12 = arith.constant 0 : index
    %10 = vector.load %arg3[%c0_11, %c0_12] : memref<1x128xf32, #tpu.memory_space<vmem>>, vector<1x128xf32>
    %11 = arith.addf %9, %10 : vector<1x128xf32>
    %c0_13 = arith.constant 0 : index
    %c0_14 = arith.constant 0 : index
    %c0_15 = arith.constant 0 : index
    %12 = vector.load %arg5[%c0_13, %c0_14, %c0_15] : memref<1x1x128xf32, #tpu.memory_space<vmem>>, vector<1x1x128xf32>
    %13 = vector.shape_cast %12 : vector<1x1x128xf32> to vector<1x128xf32>
    %14 = vector.shape_cast %11 : vector<1x128xf32> to vector<1x1x128xf32>
    tpu.vector_store %arg5[%c0_13, %c0_14, %c0_15], %14 {strides = array<i32>} : memref<1x1x128xf32, #tpu.memory_space<vmem>>, vector<1x1x128xf32>,
    return
  }
  func.func @transform_0(%arg0: i32) -> (i32, i32, i32, i32) {
    %c0_i32 = arith.constant 0 : i32
    %c0_i32_0 = arith.constant 0 : i32
    %c0_i32_1 = arith.constant 0 : i32
    %c0_i32_2 = arith.constant 0 : i32
    return %arg0, %c0_i32, %c0_i32_0, %c0_i32_1 : i32, i32, i32, i32
  }
  func.func @transform_1(%arg0: i32) -> (i32, i32) {
    %c0_i32 = arith.constant 0 : i32
    %c0_i32_0 = arith.constant 0 : i32
    %c0_i32_1 = arith.constant 0 : i32
    return %c0_i32, %c0_i32_0 : i32, i32
  }
  func.func @transform_2(%arg0: i32) -> (i32, i32) {
    %c0_i32 = arith.constant 0 : i32
    %c0_i32_0 = arith.constant 0 : i32
    %c0_i32_1 = arith.constant 0 : i32
    return %c0_i32, %c0_i32_0 : i32, i32
  }
  func.func @transform_3(%arg0: i32) -> (i32, i32, i32) {
    %c0_i32 = arith.constant 0 : i32
    %c0_i32_0 = arith.constant 0 : i32
    %c0_i32_1 = arith.constant 0 : i32
    return %arg0, %c0_i32, %c0_i32_0 : i32, i32, i32
  }
  func.func @transform_4(%arg0: i32) -> (i32, i32, i32) {
    %c0_i32 = arith.constant 0 : i32
    %c0_i32_0 = arith.constant 0 : i32
    %c0_i32_1 = arith.constant 0 : i32
    return %arg0, %c0_i32, %c0_i32_0 : i32, i32, i32
  }
}

</mosaic_0001>

<bundles_post_ra>
// kernel: tpu_custom_call.1
= control target key start
LH: loop header
LB: loop body
LE: loop exit
PB: predicated region body
PF: predicated region fallthrough
CT: control target
= control target key end

     0   :  { %10 = vsyncpa [#allocation3], 0  ;;  %s964_s0 = inlined_call_operand.vmem [shape: f32[2,8,32,16], index: 0, kind: input, shape index: {}]   ;;  %s965_s1 = inlined_call_operand.vmem [shape: f32[32,128], index: 1, kind: input, shape index: {}]   ;;  %s966_s2 = inlined_call_operand.vmem [shape: f32[1,128], index: 2, kind: input, shape index: {}]   ;;  %s967_s3 = inlined_call_operand.hbm [shape: f32[2,1,32], index: 3, kind: output, shape index: {0}]   ;;  %s968_s4 = inlined_call_operand.hbm [shape: f32[2,1,128], index: 4, kind: output, shape index: {1}]  }
   0x1   :  { %12 = vsyncpa [#allocation3 + $0x1], 0 }
   0x2   :  { %13 = vsyncpa [#allocation5], 0 }
   0x3   :  { %15 = vsyncpa [#allocation5 + $0x1], 0  ;;  %s747_s15 = smov 0   ;;  %s749_s16 = smov 0  }
   0x4   :  { %s751_s17 = smov 0   ;;  %s753_s18 = smov 0  }
   0x5 LB: > { %s768_s19 = sadd.s32 4294967295, %s715_s18   ;;  %s540_s20 = sadd.s32 4294967294, %s715_s18   ;;  %s715_s18 = sphi %s753_s18, %s974_s18   ;;  %s711_s17 = sphi %s751_s17, %s973_s17   ;;  %s707_s16 = sphi %s749_s16, %s972_s16   ;;  %s703_s15 = sphi %s747_s15, %s971_s15  }
   0x6   : > { %s772_s21 = sadd.s32 1, %s715_s18   ;;  %s96_s22 = sadd.s32 1, %s711_s17 }
   0x7   : > { %s93_s23 = ssub.s32 %s715_s18, %s772_s21  ;;  %p106_p0 = scmp.ne.s32.totalorder %s711_s17, %s707_s16 }
   0x8   : > { %p94_p1 = scmp.eq.s32.totalorder %s93_s23, 0  ;;  %p107_p2 = scmp.eq.s32.totalorder %s768_s19, 1 }
   0x9   : > { %p112_p3 = scmp.ne.s32.totalorder %s707_s16, %s703_s15  ;;  %p113_p4 = scmp.eq.s32.totalorder %s540_s20, 1 }
   0xa   : > { %s783_s24 = scalar_select %p94_p1, %s711_s17, %s96_s22  }
   0xb   : > { %p785_p5 = por %p107_p2, %p106_p0  ;;  %p789_p6 = por %p113_p4, %p112_p3 }
   0xc   : > { %p543_p7 = scmp.ge.s32.totalorder %s715_s18, 1  ;;  %p171_p8 = scmp.lt.s32.totalorder %s715_s18, 3 }
   0xe   : > { %p172_p9 = pnand %p543_p7, %p171_p8 }
   0xf   : > { %p200_p10 = scmp.lt.s32.totalorder (!%p172_p9), %s768_s19, 1  ;;  %vm237_vm0 = vcmask (!%p172_p9), 130048   ;;  %vm718_vm1 = vmmov (!%p172_p9), 0   ;;  %vm329_vm2 = vcmask (!%p172_p9), 130112   ;;  %vm336_vm3 = vcmask (!%p172_p9), 195712   ;;  %s883_s14 = sand.u32 (!%p172_p9), 1, %s707_s16  }
  0x10   : > { %175 = sbr.rel (%p172_p9) target bundleno = 426 (0x1aa), region = 32  ;;  %vm343_vm4 = vcmask (!%p172_p9), 261312   ;;  %vm353_vm5 = vcmask (!%p172_p9), 261120   ;;  %vm346_vm6 = vcmask (!%p172_p9), 253952   ;;  %s193_s20 = scalar_lea.vmem (!%p172_p9), [#allocation2], %s883_s14 }
  0x11   : > { %s547_s22 = sshll.u32 (!%p172_p9), %s768_s19, 4  ;;  %s444_s23 = sshll.u32 (!%p172_p9), %s193_s20, 4  ;;  %s445_s23 = int_to_ptr.vmem [resolvable:$true] %s444_s23 }
  0x12   : > { %s892_s29 = scalar_lea.hbm (!%p172_p9), %s967_s3, %s547_s22  ;;  %s428_s30 = scalar_lea.sflag (!%p172_p9), [#allocation3], %s883_s14 }
  0x13   : > { %s720_s6 = smov (!%p172_p9), [#allocation2]  }
  0x14   : > { %s625_s7 = sshll.u32 (!%p172_p9), %s720_s6, 4  ;;  %s626_s7 = int_to_ptr.vmem [resolvable:$false] %s625_s7 }
  0x15   : > { %s627_s8 = scalar_lea.vmem (!%p172_p9), %s626_s7, 32  ;;  %p628_p0 = scmp.lt.s32.totalorder (!%p172_p9), %s445_s23, %s626_s7 }
  0x17   : > { %s201_s27 = scalar_select %p200_p10, %s768_s19, 1 }
  0x19   : > { %s551_s28 = sshll.u32 %s201_s27, 8 }
  0x1a   : > { %s800_s5 = scalar_lea.vmem %s964_s0, %s551_s28 }
  0x1b   : > { %v205_v0 = vld [vmem:[%s800_s5] sm:$0xff]  ;;  %v207_v9 = vld [vmem:[%s800_s5 + $0x10] sm:$0xff]  ;;  %v206_v23 = vld [vmem:[%s800_s5 + $0x8] sm:$0xff] }
  0x1c   : > { %v209_v1 = vld [vmem:[%s800_s5 + $0x20] sm:$0xff]  ;;  %v238_v4 = vsel %vm237_vm0, %v205_v0, 0.0  ;;  %v211_v11 = vld [vmem:[%s800_s5 + $0x30] sm:$0xff]  ;;  %v268_v14 = vsel %vm237_vm0, %v207_v9, 0.0  ;;  %v210_v24 = vld [vmem:[%s800_s5 + $0x28] sm:$0xff]  ;;  %v253_v30 = vsel %vm237_vm0, %v206_v23, 0.0 }
  0x1d   : > { %v213_v2 = vld [vmem:[%s800_s5 + $0x40] sm:$0xff]  ;;  %v239_v5 = vsel %vm237_vm0, %v209_v1, 0.0  ;;  %v215_v12 = vld [vmem:[%s800_s5 + $0x50] sm:$0xff]  ;;  %v269_v18 = vsel %vm237_vm0, %v211_v11, 0.0  ;;  %v214_v28 = vld [vmem:[%s800_s5 + $0x48] sm:$0xff]  ;;  %v254_v31 = vsel %vm237_vm0, %v210_v24, 0.0 }
  0x1e   : > { %v217_v3 = vld [vmem:[%s800_s5 + $0x60] sm:$0xff]  ;;  %v241_v6 = vsel %vm237_vm0, %v213_v2, 0.0  ;;  %v240_v8 = vadd.f32 %v239_v5, %v238_v4  ;;  %v219_v13 = vld [vmem:[%s800_s5 + $0x70] sm:$0xff]  ;;  %v271_v19 = vsel %vm237_vm0, %v215_v12, 0.0  ;;  %v270_v22 = vadd.f32 %v269_v18, %v268_v14  ;;  %v218_v29 = vld [vmem:[%s800_s5 + $0x68] sm:$0xff] }
  0x1f   : > { %v221_v7 = vld [vmem:[%s800_s5 + $0x80] sm:$0xff]  ;;  %v243_v10 = vsel %vm237_vm0, %v217_v3, 0.0  ;;  %v223_v21 = vld [vmem:[%s800_s5 + $0x90] sm:$0xff]  ;;  %v273_v27 = vsel %vm237_vm0, %v219_v13, 0.0  ;;  %v222_v35 = vld [vmem:[%s800_s5 + $0x88] sm:$0xff]  ;;  %v255_v36 = vadd.f32 %v254_v31, %v253_v30  ;;  %v256_v37 = vsel %vm237_vm0, %v214_v28, 0.0 }
  0x20   : > { %v225_v15 = vld [vmem:[%s800_s5 + $0xa0] sm:$0xff]  ;;  %v242_v17 = vadd.f32 %v241_v6, %v240_v8  ;;  %v245_v20 = vsel %vm237_vm0, %v221_v7, 0.0  ;;  %v227_v26 = vld [vmem:[%s800_s5 + $0xb0] sm:$0xff]  ;;  %v272_v34 = vadd.f32 %v271_v19, %v270_v22  ;;  %v275_v40 = vsel %vm237_vm0, %v223_v21, 0.0  ;;  %v208_v42 = vld [vmem:[%s800_s5 + $0x18] sm:$0xff] }
  0x21   : > { %v229_v16 = vld [vmem:[%s800_s5 + $0xc0] sm:$0xff]  ;;  %v247_v33 = vsel %vm237_vm0, %v225_v15, 0.0  ;;  %v258_v41 = vsel %vm237_vm0, %v218_v29, 0.0  ;;  %v212_v43 = vld [vmem:[%s800_s5 + $0x38] sm:$0xff]  ;;  %v231_v45 = vld [vmem:[%s800_s5 + $0xd0] sm:$0xff]  ;;  %v277_v47 = vsel %vm237_vm0, %v227_v26, 0.0  ;;  %v257_v49 = vadd.f32 %v256_v37, %v255_v36 }
  0x22   : > { %v244_v25 = vadd.f32 %v243_v10, %v242_v17  ;;  %v233_v32 = vld [vmem:[%s800_s5 + $0xe0] sm:$0xff]  ;;  %v249_v39 = vsel %vm237_vm0, %v229_v16, 0.0  ;;  %v216_v44 = vld [vmem:[%s800_s5 + $0x58] sm:$0xff]  ;;  %v274_v46 = vadd.f32 %v273_v27, %v272_v34  ;;  %v226_v48 = vld [vmem:[%s800_s5 + $0xa8] sm:$0xff]  ;;  %v283_v51 = vsel %vm237_vm0, %v208_v42, 0.0 }
  0x23   : > { %v220_v50 = vld [vmem:[%s800_s5 + $0x78] sm:$0xff]  ;;  %v260_v53 = vsel %vm237_vm0, %v222_v35, 0.0  ;;  %v284_v54 = vsel %vm237_vm0, %v212_v43, 0.0  ;;  %v286_v55 = vsel %vm237_vm0, %v216_v44, 0.0  ;;  %v251_v56 = vsel %vm237_vm0, %v233_v32, 0.0  ;;  %v235_v57 = vld [vmem:[%s800_s5 + $0xf0] sm:$0xff] }
  0x24   : > { %v246_v38 = vadd.f32 %v245_v20, %v244_v25  ;;  %v276_v58 = vadd.f32 %v275_v40, %v274_v46  ;;  %v230_v59 = vld [vmem:[%s800_s5 + $0xc8] sm:$0xff]  ;;  %v259_v60 = vadd.f32 %v258_v41, %v257_v49  ;;  %v224_v61 = vld [vmem:[%s800_s5 + $0x98] sm:$0xff]  ;;  %v285_v62 = vadd.f32 %v284_v54, %v283_v51  ;;  %v348_v32 = vld [vmem:[%s965_s1] sm:$0xff] }
  0x25   : > { %v279_v0 = vsel %vm237_vm0, %v231_v45, 0.0  ;;  %v262_v1 = vsel %vm237_vm0, %v226_v48, 0.0  ;;  %v288_v2 = vsel %vm237_vm0, %v220_v50, 0.0  ;;  %v234_v4 = vld [vmem:[%s800_s5 + $0xe8] sm:$0xff]  ;;  %v228_v6 = vld [vmem:[%s800_s5 + $0xb8] sm:$0xff]  ;;  %v281_v9 = vsel %vm237_vm0, %v235_v57, 0.0 }
  0x26   : > { %v248_v52 = vadd.f32 %v247_v33, %v246_v38  ;;  %v278_v3 = vadd.f32 %v277_v47, %v276_v58  ;;  %v261_v5 = vadd.f32 %v260_v53, %v259_v60  ;;  %v287_v7 = vadd.f32 %v286_v55, %v285_v62  ;;  %v232_v14 = vld [vmem:[%s800_s5 + $0xd8] sm:$0xff]  ;;  %v349_v33 = vld [vmem:[%s965_s1 + $0x8] sm:$0xff]  ;;  %v350_v36 = vld [vmem:[%s965_s1 + $0x10] sm:$0xff] }
  0x27   : > { %v264_v10 = vsel %vm237_vm0, %v230_v59, 0.0  ;;  %v290_v11 = vsel %vm237_vm0, %v224_v61, 0.0  ;;  %v266_v17 = vsel %vm237_vm0, %v234_v4, 0.0  ;;  %v292_v18 = vsel %vm237_vm0, %v228_v6, 0.0  ;;  %v236_v21 = vld [vmem:[%s800_s5 + $0xf8] sm:$0xff]  ;;  %s621_s5 = scalar_lea.vmem %s445_s23, 16 }
  0x28   : > { %v250_v63 = vadd.f32 %v249_v39, %v248_v52  ;;  %v280_v12 = vadd.f32 %v279_v0, %v278_v3  ;;  %v263_v13 = vadd.f32 %v262_v1, %v261_v5  ;;  %v289_v15 = vadd.f32 %v288_v2, %v287_v7  ;;  %v351_v37 = vld [vmem:[%s965_s1 + $0x18] sm:$0xff]  ;;  %p622_p11 = scmp.ne.s32.totalorder %s445_s23, %s621_s5  ;;  %p629_p1 = scmp.lt.s32.totalorder %s627_s8, %s621_s5 }
  0x29   : > { %v294_v23 = vsel %vm237_vm0, %v232_v14, 0.0  ;;  %v296_v27 = vsel %vm237_vm0, %v236_v21, 0.0  ;;  %v569_v34 = vpack.c.bf16 %v349_v33, %v348_v32  ;;  %v717_v35 = vmov 0.0|0.0  }
  0x2a   : > { %v252_v8 = vadd.f32 %v251_v56, %v250_v63  ;;  %v282_v19 = vadd.f32 %v281_v9, %v280_v12  ;;  %v265_v20 = vadd.f32 %v264_v10, %v263_v13  ;;  %v291_v22 = vadd.f32 %v290_v11, %v289_v15  ;;  %568 = vmatprep.subr.bf16.mxu0 %v717_v35  ;;  %p623_p12 = pnand %p622_p11, %p785_p5  ;;  %p630_p2 = por %p629_p1, %p628_p0 }
  0x2b   : > { %570 = vmatpush3.bf16.msra.mxu0 %v569_v34  ;;  %v572_v38 = vpack.c.bf16 %v351_v37, %v350_v36  ;;  %v719_v39 = vmov 0.0   ;;  %v318_v40 = vlaneseq }
  0x2c   : > { %v298_v16 = vsel %vm237_vm0, %v252_v8, 0.0  ;;  %v304_v24 = vsel %vm237_vm0, %v282_v19, 0.0  ;;  %v267_v25 = vadd.f32 %v266_v17, %v265_v20  ;;  %v293_v26 = vadd.f32 %v292_v18, %v291_v22  ;;  %571 = vmatprep.subr.bf16.mxu0 %v717_v35  ;;  %565 = vmatprep.mubr.msk.f32.mxu0 %vm718_vm1, %v719_v39  ;;  %p624_p13 = pneg %p623_p12 }
  0x2d   : > { %299 = vadd.xlane.f32.xlu0 %v298_v16  ;;  %305 = vadd.xlane.f32.xlu1 %v304_v24  ;;  %v319_v41 = vand.u32 127, %v318_v40  ;;  %v321_v42 = vshrl.u32 %v318_v40, 7 }
  0x2e   : > { %v301_v28 = vsel %vm237_vm0, %v267_v25, 0.0  ;;  %v295_v29 = vadd.f32 %v294_v23, %v293_v26  ;;  %p631_p3 = pnand %p630_p2, %p624_p13 }
  0x2f   : > { %573 = vmatpush3.bf16.msra.mxu0 %v572_v38  ;;  %v324_v44 = vadd.s32 4294967288, %v319_v41  ;;  %v331_v45 = vadd.s32 4294967280, %v319_v41  ;;  %v322_v47 = vsub.s32 %v319_v41, %v321_v42  ;;  %v338_v50 = vadd.s32 4294967272, %v319_v41 }
  0x30   : > { %v297_v30 = vadd.f32 %v296_v27, %v295_v29 }
  0x31   : > { %302 = vadd.xlane.f32.xlu0 %v301_v28  ;;  %v327_v49 = vsub.s32 %v324_v44, %v321_v42  ;;  %v334_v51 = vsub.s32 %v331_v45, %v321_v42  ;;  %v341_v57 = vsub.s32 %v338_v50, %v321_v42 }
  0x32   : > { %v307_v31 = vsel %vm237_vm0, %v297_v30, 0.0 }
  0x33   : > { %308 = vadd.xlane.f32.xlu1 %v307_v31 }
  0xba   : > { %v300_v43 = vpop.xlane.xlu0 %299  ;;  %v306_v46 = vpop.xlane.xlu1 %305 }
  0xbb   : > { %v310_v48 = vmul.f32 0.0078125, %v300_v43  ;;  %v312_v52 = vmul.f32 0.0078125, %v306_v46 }
  0xbd   : > { %v323_v55 = vrot.slane %v310_v48, %v322_v47  ;;  %v335_v58 = vrot.slane %v312_v52, %v334_v51 }
  0xbe   : > { %v303_v53 = vpop.xlane.xlu0 %302 }
  0xbf   : > { %v311_v54 = vmul.f32 0.0078125, %v303_v53 }
  0xc0   : > { %v309_v59 = vpop.xlane.xlu1 %308 }
  0xc1   : > { %v328_v56 = vrot.slane %v311_v54, %v327_v49  ;;  %v313_v61 = vmul.f32 0.0078125, %v309_v59 }
  0xc3   : > { %v330_v60 = vsel %vm329_vm2, %v328_v56, %v323_v55  ;;  %v342_v63 = vrot.slane %v313_v61, %v341_v57 }
  0xc4   : > { %v337_v62 = vsel %vm336_vm3, %v335_v58, %v330_v60 }
  0xc5   : > { %v344_v0 = vsel %vm343_vm4, %v342_v63, %v337_v62 }
  0xc6   : > { %566 = vmatmul.mubr.msk.f32.vlgmr.msra.gmra.mrb[0].mxu0 %vm353_vm5, %v344_v0  ;;  %347 = vst.msk [vmem:[%s193_s20] sm:$0x1] %vm346_vm6, %v344_v0 }
  0xc7   : > { %634 = shalt.err (!%p631_p3)
}
  0xc8   : > { %s635_s9 = scalar_lea.hbm %s892_s29, 16  ;;  %s639_s12 = scalar_lea.hbm %s967_s3, 32 }
  0xc9   : > { %p636_p4 = scmp.ne.s32.totalorder %s892_s29, %s635_s9  ;;  %p640_p9 = scmp.lt.u32.totalorder %s892_s29, %s967_s3 }
  0xca   : > { %p641_p10 = scmp.lt.u32.totalorder %s639_s12, %s635_s9  ;;  %p643_p12 = scmp.lt.u32.totalorder %s635_s9, %s892_s29 }
  0xcb   : > { %p637_p7 = pnand %p636_p4, %p785_p5 }
  0xcc   : > { %p642_p11 = por %p641_p10, %p640_p9 }
  0xcd   : > { %p638_p8 = pneg %p637_p7 }
  0xce   : > { %p644_p13 = por %p643_p12, %p642_p11 }
  0xd0   : > { %p645_p0 = pnand %p644_p13, %p638_p8 }
  0xd2   : > { %648 = shalt.err (!%p645_p0)
}
  0xd3   : > { %574 = dma.vmem_to_hbm [thread:$0]  (%p785_p5), %s445_s23, 16, %s892_s29, %s428_s30   ;;  %v352_v1 = vld [vmem:[%s966_s2] sm:$0x1] }
  0xd4   : > { %s199_s5 = scalar_lea.vmem [#allocation4], %s883_s14  ;;  %s921_s9 = scalar_lea.hbm %s968_s4, %s547_s22 }
  0xd5   : > { %s457_s6 = sshll.u32 %s199_s5, 4  ;;  %s432_s23 = scalar_lea.sflag [#allocation5], %s883_s14  ;;  %s923_s6 = int_to_ptr.vmem [resolvable:$true] %s457_s6 }
  0xd6   : > { %s649_s29 = scalar_lea.vmem %s923_s6, 16  ;;  %s721_s30 = smov [#allocation4]  }
  0xd7   : > { %p650_p1 = scmp.ne.s32.totalorder %s923_s6, %s649_s29  ;;  %s653_s10 = sshll.u32 %s721_s30, 4  ;;  %s654_s10 = int_to_ptr.vmem [resolvable:$false] %s653_s10 }
  0xd8   : > { %s655_s19 = scalar_lea.vmem %s654_s10, 32  ;;  %p656_p4 = scmp.lt.s32.totalorder %s923_s6, %s654_s10 }
  0xd9   : > { %p651_p2 = pnand %p650_p1, %p785_p5  ;;  %p657_p7 = scmp.lt.s32.totalorder %s655_s19, %s649_s29 }
  0xdb   : > { %p652_p3 = pneg %p651_p2  ;;  %p658_p8 = por %p657_p7, %p656_p4 }
  0xdd   : > { %p659_p9 = pnand %p658_p8, %p652_p3 }
 0x199   : > { %v422_v2 = vpop.f32.mrb[0].mxu0 }
 0x19a   : > { %v423_v3 = vadd.f32 %v422_v2, %v352_v1  ;;  %v567_v4 = vpop.f32.mrb[1].mxu0 }
 0x19c   : > { %426 = vst [vmem:[%s199_s5] sm:$0x1] %v423_v3 }
 0x19d   : > { %662 = shalt.err (!%p659_p9)
}
 0x19e   : > { %s663_s14 = scalar_lea.hbm %s921_s9, 16  ;;  %s667_s12 = scalar_lea.hbm %s968_s4, 32 }
 0x19f   : > { %p664_p10 = scmp.ne.s32.totalorder %s921_s9, %s663_s14  ;;  %p668_p13 = scmp.lt.u32.totalorder %s921_s9, %s968_s4 }
 0x1a0   : > { %p669_p0 = scmp.lt.u32.totalorder %s667_s12, %s663_s14  ;;  %p671_p2 = scmp.lt.u32.totalorder %s663_s14, %s921_s9 }
 0x1a1   : > { %p665_p11 = pnand %p664_p10, %p785_p5 }
 0x1a2   : > { %p670_p1 = por %p669_p0, %p668_p13 }
 0x1a3   : > { %p666_p12 = pneg %p665_p11 }
 0x1a4   : > { %p672_p3 = por %p671_p2, %p670_p1 }
 0x1a6   : > { %p673_p4 = pnand %p672_p3, %p666_p12 }
 0x1a8   : > { %676 = shalt.err (!%p673_p4)
}
 0x1a9   : > { %575 = dma.vmem_to_hbm [thread:$0]  (%p785_p5), %s923_s6, 16, %s921_s9, %s432_s23  }
 0x1aa PF: > { %p585_p7 = scmp.ge.s32.totalorder %s715_s18, 2  ;;  %s469_s27 = sand.u32 1, %s703_s15  }
 0x1ab   : > { %s470_s28 = scalar_lea.sflag [#allocation3], %s469_s27 }
 0x1ac   : > { %p579_p8 = pnand %p585_p7, %p789_p6 }
 0x1ae   : > { %694 = dma.done.wait (!%p579_p8), %s470_s28, 16  }
 0x1af   : > { %696 = vsyncadd (!%p579_p8), %s470_s28, 4294967280  ;;  %s478_s5 = scalar_lea.sflag [#allocation5], %s469_s27 }
 0x1b0   : > { %698 = dma.done.wait (!%p579_p8), %s478_s5, 16  }
 0x1b1   : > { %700 = vsyncadd (!%p579_p8), %s478_s5, 4294967280  ;;  %p18_p5 = scmp.ge.s32.totalorder %s772_s21, 4   ;;  %s971_s15 = smov %s707_s16 }
 0x1b2   : > { %s972_s16 = smov %s711_s17  ;;  %s973_s17 = smov %s783_s24 }
 0x1b3   : > { %s974_s18 = smov %s772_s21  ;;  %20 = sbr.rel (!%p18_p5) target bundleno = 5 (0x5), region = 84 }
 0x1ba   :  { %482 = vsyncpa [#allocation3], 1 }
 0x1bb   :  { %484 = vsyncpa [#allocation3 + $0x1], 1 }
 0x1bc   :  { %485 = vsyncpa [#allocation5], 1 }
 0x1bd   :  { %487 = vsyncpa [#allocation5 + $0x1], 1 }

</bundles_post_ra>
